<compile_context>
chip_gen: v6e
topology: v6e:2x2x1
jax: 0.10.0
libtpu: 0.0.40
codegen_flags: <defaults>
</compile_context>

<pallas_src>
import jax
import jax.numpy as jnp
from jax.experimental import pallas as pl
from jax.experimental.pallas import tpu as pltpu


def _round_up(v, m):
    return ((v + m - 1) // m) * m


def single_conv(x_nchw, weight_oihw, bias, *, compute_dtype=jnp.float32,
                b_blk=None):
    """Forward of SingleConv(norm='none'): 3x3 conv (padding=1) + bias + ReLU.

    x_nchw:      (N, Cin, H, W)    float32 (PyTorch layout)
    weight_oihw: (Cout, Cin, 3, 3) float32 (PyTorch layout)
    bias:        (Cout,)           float32
    returns:     (N, Cout, H, W)   float32

    compute_dtype: dtype of the MXU operands.  jnp.bfloat16 is the recommended
    production setting on v6e/v7x (halves HBM/VMEM traffic, native MXU path);
    accumulation and the bias+ReLU epilogue stay f32 either way.  Default f32
    to match PyTorch fp32 numerics exactly.
    b_blk: images per grid step.  Default ceil(N/2) keeps >=2 grid steps so
    the batch axis can still shard across v7x's two TensorCores.
    """
    N, Cin, H, W = x_nchw.shape
    Cout = weight_oihw.shape[0]
    HW = H * W

    # --- batch blocking ---------------------------------------------------
    if b_blk is None:
        b_blk = max(1, (N + 1) // 2)
    b_blk = max(1, min(b_blk, N))
    n_steps = -(-N // b_blk)
    N_pad = n_steps * b_blk

    # --- layout constants ---------------------------------------------------
    Cin_pad = _round_up(Cin, 8)      # sublane-aligned tap blocks in im2col
    PAD = _round_up(W + 1, 128)      # lane-aligned halo for the flat image

    # --- wrapper-side repacks (cheap; weights/bias/masks are grid-invariant) -
    x_flat = x_nchw.reshape(N, Cin, HW).astype(compute_dtype)   # free reshape
    if N_pad != N:
        x_flat = jnp.concatenate(
            [x_flat, jnp.zeros((N_pad - N, Cin, HW), compute_dtype)], axis=0)

    # (Cout, Cin, 3, 3) -> (Cout, dy, dx, Cin) -> zero-pad Cin -> (Cout, 9*Cin')
    # K index = (dy*3 + dx)*Cin_pad + ci, matching the im2col row order below.
    w_t = jnp.transpose(weight_oihw, (0, 2, 3, 1))
    if Cin_pad != Cin:
        w_t = jnp.pad(w_t, ((0, 0), (0, 0), (0, 0), (0, Cin_pad - Cin)))
    w_mat = w_t.reshape(Cout, 9 * Cin_pad).astype(compute_dtype)
    b_col = bias.reshape(Cout, 1).astype(jnp.float32)

    # Precomputed row-wrap masks (one per dx=-1 / dx=+1 tap), grid-invariant.
    col = jnp.arange(HW, dtype=jnp.int32) % W
    masks = jnp.stack([(col > 0).astype(jnp.float32),        # has left nbr
                       (col < W - 1).astype(jnp.float32)],   # has right nbr
                      axis=0)                                 # (2, HW)

    def kernel(x_ref, w_ref, b_ref, m_ref, o_ref, xpad_ref, im2col_ref):
        # x_ref:      (b_blk, Cin, HW)          flat images, HW on lanes
        # w_ref:      (Cout, 9*Cin_pad)         weights (grid-invariant)
        # b_ref:      (Cout, 1)                 bias column (grid-invariant)
        # m_ref:      (2, HW)                   row-wrap masks (grid-invariant)
        # o_ref:      (b_blk, Cout, HW)         lane-dense output block
        # xpad_ref:   (Cin_pad, 2*PAD + HW)     zero-edged flat image (halo)
        # im2col_ref: (9*Cin_pad, b_blk*HW)     fused-contraction RHS

        # Zero the halo scratch once per step (cheap at this width; cannot be
        # program_id-gated because the parallel batch axis may start at any
        # index on either TensorCore).  The interior is overwritten per image.
        xpad_ref[...] = jnp.zeros_like(xpad_ref)

        # Row-wrap selects (bitwise, so bf16-safe on v5e).  Hoisted once per
        # step; the only VPU setup is two (1, HW) compares + sublane broadcast.
        not_left = jnp.broadcast_to(m_ref[0:1, :] > 0.0, (Cin_pad, HW))
        not_right = jnp.broadcast_to(m_ref[1:2, :] > 0.0, (Cin_pad, HW))
        zero_tap = jnp.zeros((Cin_pad, HW), compute_dtype)

        for b in range(b_blk):                       # static unroll, small
            # Interior (lane-aligned store at offset PAD); padded channel rows
            # stay zero from the scratch clear above.
            xpad_ref[:Cin, PAD:PAD + HW] = x_ref[b]
            for dy in range(3):
                for dx in range(3):
                    s = (dy - 1) * W + (dx - 1)              # flat src offset
                    tap = xpad_ref[:, PAD + s:PAD + s + HW]  # (Cin_pad, HW)
                    if dx == 0:
                        tap = jnp.where(not_left, tap, zero_tap)
                    elif dx == 2:
                        tap = jnp.where(not_right, tap, zero_tap)
                    t = dy * 3 + dx
                    # Sublane offset t*Cin_pad (multiple of 8) and lane offset
                    # b*HW (multiple of 128 here) => unmasked full-tile store.
                    im2col_ref[t * Cin_pad:(t + 1) * Cin_pad,
                               b * HW:(b + 1) * HW] = tap

        # One fused, weight-stationary MXU contraction over the whole block:
        # (Cout, 9*Cin_pad) @ (9*Cin_pad, b_blk*HW), f32 accumulation.
        acc = jnp.dot(w_ref[...], im2col_ref[...],
                      preferred_element_type=jnp.float32)
        acc = jnp.maximum(acc + b_ref[...], 0.0)     # bias + ReLU, f32 epilogue
        for b in range(b_blk):
            o_ref[b] = acc[:, b * HW:(b + 1) * HW].astype(o_ref.dtype)

    itemsize = jnp.dtype(compute_dtype).itemsize
    cost = pl.CostEstimate(
        flops=2 * N_pad * Cout * 9 * Cin * HW + 2 * N_pad * Cout * HW,
        transcendentals=0,
        bytes_accessed=(N_pad * Cin * HW * itemsize
                        + Cout * 9 * Cin_pad * itemsize
                        + Cout * 4 + 2 * HW * 4
                        + N_pad * Cout * HW * jnp.dtype(x_nchw.dtype).itemsize),
    )

    out_flat = pl.pallas_call(
        kernel,
        out_shape=jax.ShapeDtypeStruct((N_pad, Cout, HW), x_nchw.dtype),
        grid_spec=pltpu.PrefetchScalarGridSpec(
            num_scalar_prefetch=0,
            grid=(n_steps,),
            in_specs=[
                pl.BlockSpec((b_blk, Cin, HW), lambda i: (i, 0, 0)),
                # Grid-invariant blocks: constant index_map => single fetch,
                # no per-step re-DMA of weights / bias / masks.
                pl.BlockSpec((Cout, 9 * Cin_pad), lambda i: (0, 0)),
                pl.BlockSpec((Cout, 1), lambda i: (0, 0)),
                pl.BlockSpec((2, HW), lambda i: (0, 0)),
            ],
            out_specs=pl.BlockSpec((b_blk, Cout, HW), lambda i: (i, 0, 0)),
            scratch_shapes=[
                pltpu.VMEM((Cin_pad, 2 * PAD + HW), compute_dtype),   # halo
                pltpu.VMEM((9 * Cin_pad, b_blk * HW), compute_dtype), # im2col
            ],
        ),
        compiler_params=pltpu.CompilerParams(
            # Batch shards across the 2 TensorCores on v7x; near-neutral on
            # v5e/v6e.  Explicit limit raises v5e's 16 MiB scoped default and
            # stays within v7x's 64 MiB physical VMEM.
            dimension_semantics=("parallel",),
            vmem_limit_bytes=32 * 1024 * 1024,
        ),
        cost_estimate=cost,
    )(x_flat, w_mat, b_col, masks)

    # Drop batch padding (if any) and reshape back to NCHW (no data movement).
    return out_flat[:N].reshape(N, Cout, H, W)


def _reference(x_nchw, weight_oihw, bias):
    """Pure-JAX reference (lax conv) for correctness checking."""
    y = jax.lax.conv_general_dilated(
        x_nchw, weight_oihw,
        window_strides=(1, 1), padding=((1, 1), (1, 1)),
        dimension_numbers=("NCHW", "OIHW", "NCHW"),
    )
    y = y + bias[None, :, None, None]
    return jnp.maximum(y, 0.0)


if __name__ == "__main__":
    key = jax.random.PRNGKey(0)
    k_x, k_w, k_b = jax.random.split(key, 3)

    N, Cin, H, W = 2, 4, 16, 16
    Cout = 8  # mid_channels = out_channels when mid_channels is None

    x = jax.random.normal(k_x, (N, Cin, H, W), dtype=jnp.float32)
    fan_in = Cin * 3 * 3
    bound = 1.0 / (fan_in ** 0.5)
    weight = jax.random.uniform(k_w, (Cout, Cin, 3, 3),
                                minval=-bound, maxval=bound, dtype=jnp.float32)
    bias = jax.random.uniform(k_b, (Cout,),
                              minval=-bound, maxval=bound, dtype=jnp.float32)

    ref = jax.block_until_ready(_reference(x, weight, bias))

    # f32 MXU operands: matches PyTorch fp32 numerics.
    out = jax.block_until_ready(single_conv(x, weight, bias))
    assert out.shape == (N, Cout, H, W), out.shape
    max_err = float(jnp.max(jnp.abs(out - ref)))
    assert jnp.allclose(out, ref, atol=5e-4, rtol=5e-4), max_err

    # bf16 MXU operands (recommended production default on v6e/v7x): f32
    # accumulation + f32 epilogue; looser tolerance vs the fp32 reference.
    out_bf16 = jax.block_until_ready(
        single_conv(x, weight, bias, compute_dtype=jnp.bfloat16))
    max_err_bf16 = float(jnp.max(jnp.abs(out_bf16 - ref)))
    assert jnp.allclose(out_bf16, ref, atol=5e-2, rtol=5e-2), max_err_bf16

    print("KERNEL_OK")
</pallas_src>

<mosaic_0001>
module attributes {stable_mosaic.version = 11 : i64} {
  func.func @kernel(%arg0: i32, %arg1: memref<1x4x256xf32, #tpu.memory_space<vmem>>, %arg2: memref<8x72xf32, #tpu.memory_space<vmem>>, %arg3: memref<8x1xf32, #tpu.memory_space<vmem>>, %arg4: memref<2x256xf32, #tpu.memory_space<vmem>>, %arg5: memref<1x8x256xf32, #tpu.memory_space<vmem>>, %arg6: memref<8x512xf32, #tpu.memory_space<vmem>>, %arg7: memref<72x256xf32, #tpu.memory_space<vmem>>) attributes {dimension_semantics = [#tpu.dimension_semantics<parallel>], iteration_bounds = array<i64: 2>, scalar_prefetch = 0 : i64, scratch_operands = 2 : i64, tpu.core_type = #tpu.core_type<tc>, window_params = [{transform_indices = @transform_0, window_bounds = array<i64: 1, 4, 256>}, {pipeline_mode = #tpu.pipeline_mode<synchronous>, transform_indices = @transform_1, window_bounds = array<i64: 8, 72>}, {pipeline_mode = #tpu.pipeline_mode<synchronous>, transform_indices = @transform_2, window_bounds = array<i64: 8, 1>}, {pipeline_mode = #tpu.pipeline_mode<synchronous>, transform_indices = @transform_3, window_bounds = array<i64: 2, 256>}, {transform_indices = @transform_4, window_bounds = array<i64: 1, 8, 256>}]} {
    %cst = arith.constant 0.000000e+00 : f32
    %0 = vector.broadcast %cst : f32 to vector<8x512xf32>
    %c0 = arith.constant 0 : index
    %c0_0 = arith.constant 0 : index
    %1 = vector.load %arg6[%c0, %c0_0] : memref<8x512xf32, #tpu.memory_space<vmem>>, vector<8x512xf32>
    tpu.vector_store %arg6[%c0, %c0_0], %0 {strides = array<i32>} : memref<8x512xf32, #tpu.memory_space<vmem>>, vector<8x512xf32>,
    %c0_1 = arith.constant 0 : index
    %c0_2 = arith.constant 0 : index
    %2 = vector.load %arg4[%c0_1, %c0_2] : memref<2x256xf32, #tpu.memory_space<vmem>>, vector<1x256xf32>
    %cst_3 = arith.constant 0.000000e+00 : f32
    %3 = vector.broadcast %cst_3 : f32 to vector<1x256xf32>
    %4 = arith.cmpf ogt, %2, %3 : vector<1x256xf32>
    %5 = vector.shape_cast %4 : vector<1x256xi1> to vector<1x256xi1>
    %6 = vector.broadcast %5 : vector<1x256xi1> to vector<8x256xi1>
    %c1 = arith.constant 1 : index
    %c0_4 = arith.constant 0 : index
    %7 = vector.load %arg4[%c1, %c0_4] : memref<2x256xf32, #tpu.memory_space<vmem>>, vector<1x256xf32>
    %cst_5 = arith.constant 0.000000e+00 : f32
    %8 = vector.broadcast %cst_5 : f32 to vector<1x256xf32>
    %9 = arith.cmpf ogt, %7, %8 : vector<1x256xf32>
    %10 = vector.shape_cast %9 : vector<1x256xi1> to vector<1x256xi1>
    %11 = vector.broadcast %10 : vector<1x256xi1> to vector<8x256xi1>
    %cst_6 = arith.constant 0.000000e+00 : f32
    %12 = vector.broadcast %cst_6 : f32 to vector<8x256xf32>
    %c0_7 = arith.constant 0 : index
    %c0_8 = arith.constant 0 : index
    %c0_9 = arith.constant 0 : index
    %13 = vector.load %arg1[%c0_7, %c0_8, %c0_9] : memref<1x4x256xf32, #tpu.memory_space<vmem>>, vector<1x4x256xf32>
    %14 = vector.shape_cast %13 : vector<1x4x256xf32> to vector<4x256xf32>
    %c0_10 = arith.constant 0 : index
    %c128 = arith.constant 128 : index
    %15 = vector.load %arg6[%c0_10, %c128] : memref<8x512xf32, #tpu.memory_space<vmem>>, vector<4x256xf32>
    tpu.vector_store %arg6[%c0_10, %c128], %14 {strides = array<i32>} : memref<8x512xf32, #tpu.memory_space<vmem>>, vector<4x256xf32>,
    %c0_11 = arith.constant 0 : index
    %c111 = arith.constant 111 : index
    %16 = vector.load %arg6[%c0_11, %c111] : memref<8x512xf32, #tpu.memory_space<vmem>>, vector<8x256xf32>
    %17 = arith.select %6, %16, %12 : vector<8x256xi1>, vector<8x256xf32>
    %c0_12 = arith.constant 0 : index
    %c0_13 = arith.constant 0 : index
    %18 = vector.load %arg7[%c0_12, %c0_13] : memref<72x256xf32, #tpu.memory_space<vmem>>, vector<8x256xf32>
    tpu.vector_store %arg7[%c0_12, %c0_13], %17 {strides = array<i32>} : memref<72x256xf32, #tpu.memory_space<vmem>>, vector<8x256xf32>,
    %c0_14 = arith.constant 0 : index
    %c112 = arith.constant 112 : index
    %19 = vector.load %arg6[%c0_14, %c112] : memref<8x512xf32, #tpu.memory_space<vmem>>, vector<8x256xf32>
    %c8 = arith.constant 8 : index
    %c0_15 = arith.constant 0 : index
    %20 = vector.load %arg7[%c8, %c0_15] : memref<72x256xf32, #tpu.memory_space<vmem>>, vector<8x256xf32>
    tpu.vector_store %arg7[%c8, %c0_15], %19 {strides = array<i32>} : memref<72x256xf32, #tpu.memory_space<vmem>>, vector<8x256xf32>,
    %c0_16 = arith.constant 0 : index
    %c113 = arith.constant 113 : index
    %21 = vector.load %arg6[%c0_16, %c113] : memref<8x512xf32, #tpu.memory_space<vmem>>, vector<8x256xf32>
    %22 = arith.select %11, %21, %12 : vector<8x256xi1>, vector<8x256xf32>
    %c16 = arith.constant 16 : index
    %c0_17 = arith.constant 0 : index
    %23 = vector.load %arg7[%c16, %c0_17] : memref<72x256xf32, #tpu.memory_space<vmem>>, vector<8x256xf32>
    tpu.vector_store %arg7[%c16, %c0_17], %22 {strides = array<i32>} : memref<72x256xf32, #tpu.memory_space<vmem>>, vector<8x256xf32>,
    %c0_18 = arith.constant 0 : index
    %c127 = arith.constant 127 : index
    %24 = vector.load %arg6[%c0_18, %c127] : memref<8x512xf32, #tpu.memory_space<vmem>>, vector<8x256xf32>
    %25 = arith.select %6, %24, %12 : vector<8x256xi1>, vector<8x256xf32>
    %c24 = arith.constant 24 : index
    %c0_19 = arith.constant 0 : index
    %26 = vector.load %arg7[%c24, %c0_19] : memref<72x256xf32, #tpu.memory_space<vmem>>, vector<8x256xf32>
    tpu.vector_store %arg7[%c24, %c0_19], %25 {strides = array<i32>} : memref<72x256xf32, #tpu.memory_space<vmem>>, vector<8x256xf32>,
    %c0_20 = arith.constant 0 : index
    %c128_21 = arith.constant 128 : index
    %27 = vector.load %arg6[%c0_20, %c128_21] : memref<8x512xf32, #tpu.memory_space<vmem>>, vector<8x256xf32>
    %c32 = arith.constant 32 : index
    %c0_22 = arith.constant 0 : index
    %28 = vector.load %arg7[%c32, %c0_22] : memref<72x256xf32, #tpu.memory_space<vmem>>, vector<8x256xf32>
    tpu.vector_store %arg7[%c32, %c0_22], %27 {strides = array<i32>} : memref<72x256xf32, #tpu.memory_space<vmem>>, vector<8x256xf32>,
    %c0_23 = arith.constant 0 : index
    %c129 = arith.constant 129 : index
    %29 = vector.load %arg6[%c0_23, %c129] : memref<8x512xf32, #tpu.memory_space<vmem>>, vector<8x256xf32>
    %30 = arith.select %11, %29, %12 : vector<8x256xi1>, vector<8x256xf32>
    %c40 = arith.constant 40 : index
    %c0_24 = arith.constant 0 : index
    %31 = vector.load %arg7[%c40, %c0_24] : memref<72x256xf32, #tpu.memory_space<vmem>>, vector<8x256xf32>
    tpu.vector_store %arg7[%c40, %c0_24], %30 {strides = array<i32>} : memref<72x256xf32, #tpu.memory_space<vmem>>, vector<8x256xf32>,
    %c0_25 = arith.constant 0 : index
    %c143 = arith.constant 143 : index
    %32 = vector.load %arg6[%c0_25, %c143] : memref<8x512xf32, #tpu.memory_space<vmem>>, vector<8x256xf32>
    %33 = arith.select %6, %32, %12 : vector<8x256xi1>, vector<8x256xf32>
    %c48 = arith.constant 48 : index
    %c0_26 = arith.constant 0 : index
    %34 = vector.load %arg7[%c48, %c0_26] : memref<72x256xf32, #tpu.memory_space<vmem>>, vector<8x256xf32>
    tpu.vector_store %arg7[%c48, %c0_26], %33 {strides = array<i32>} : memref<72x256xf32, #tpu.memory_space<vmem>>, vector<8x256xf32>,
    %c0_27 = arith.constant 0 : index
    %c144 = arith.constant 144 : index
    %35 = vector.load %arg6[%c0_27, %c144] : memref<8x512xf32, #tpu.memory_space<vmem>>, vector<8x256xf32>
    %c56 = arith.constant 56 : index
    %c0_28 = arith.constant 0 : index
    %36 = vector.load %arg7[%c56, %c0_28] : memref<72x256xf32, #tpu.memory_space<vmem>>, vector<8x256xf32>
    tpu.vector_store %arg7[%c56, %c0_28], %35 {strides = array<i32>} : memref<72x256xf32, #tpu.memory_space<vmem>>, vector<8x256xf32>,
    %c0_29 = arith.constant 0 : index
    %c145 = arith.constant 145 : index
    %37 = vector.load %arg6[%c0_29, %c145] : memref<8x512xf32, #tpu.memory_space<vmem>>, vector<8x256xf32>
    %38 = arith.select %11, %37, %12 : vector<8x256xi1>, vector<8x256xf32>
    %c64 = arith.constant 64 : index
    %c0_30 = arith.constant 0 : index
    %39 = vector.load %arg7[%c64, %c0_30] : memref<72x256xf32, #tpu.memory_space<vmem>>, vector<8x256xf32>
    tpu.vector_store %arg7[%c64, %c0_30], %38 {strides = array<i32>} : memref<72x256xf32, #tpu.memory_space<vmem>>, vector<8x256xf32>,
    %c0_31 = arith.constant 0 : index
    %c0_32 = arith.constant 0 : index
    %40 = vector.load %arg2[%c0_31, %c0_32] : memref<8x72xf32, #tpu.memory_space<vmem>>, vector<8x72xf32>
    %c0_33 = arith.constant 0 : index
    %c0_34 = arith.constant 0 : index
    %41 = vector.load %arg7[%c0_33, %c0_34] : memref<72x256xf32, #tpu.memory_space<vmem>>, vector<72x256xf32>
    %cst_35 = arith.constant dense<0.000000e+00> : vector<8x256xf32>
    %42 = tpu.matmul %40, %41, %cst_35 {dimension_numbers = #tpu.dot_dimension_numbers<[1], [0], [0], [1], [0, 0, 1, 1], [], []>} : vector<8x72xf32>, vector<72x256xf32>, vector<8x256xf32> -> vector<8x256xf32>
    %c0_36 = arith.constant 0 : index
    %c0_37 = arith.constant 0 : index
    %43 = vector.load %arg3[%c0_36, %c0_37] : memref<8x1xf32, #tpu.memory_space<vmem>>, vector<8x1xf32>
    %44 = vector.broadcast %43 : vector<8x1xf32> to vector<8x256xf32>
    %45 = arith.addf %42, %44 : vector<8x256xf32>
    %cst_38 = arith.constant 0.000000e+00 : f32
    %46 = vector.broadcast %cst_38 : f32 to vector<8x256xf32>
    %47 = arith.maximumf %45, %46 : vector<8x256xf32>
    %c0_39 = arith.constant 0 : index
    %c0_40 = arith.constant 0 : index
    %c0_41 = arith.constant 0 : index
    %48 = vector.load %arg5[%c0_39, %c0_40, %c0_41] : memref<1x8x256xf32, #tpu.memory_space<vmem>>, vector<1x8x256xf32>
    %49 = vector.shape_cast %48 : vector<1x8x256xf32> to vector<8x256xf32>
    %50 = vector.shape_cast %47 : vector<8x256xf32> to vector<1x8x256xf32>
    tpu.vector_store %arg5[%c0_39, %c0_40, %c0_41], %50 {strides = array<i32>} : memref<1x8x256xf32, #tpu.memory_space<vmem>>, vector<1x8x256xf32>,
    return
  }
  func.func @transform_0(%arg0: i32) -> (i32, i32, i32) {
    %c0_i32 = arith.constant 0 : i32
    %c0_i32_0 = arith.constant 0 : i32
    %c0_i32_1 = arith.constant 0 : i32
    return %arg0, %c0_i32, %c0_i32_0 : i32, i32, i32
  }
  func.func @transform_1(%arg0: i32) -> (i32, i32) {
    %c0_i32 = arith.constant 0 : i32
    %c0_i32_0 = arith.constant 0 : i32
    %c0_i32_1 = arith.constant 0 : i32
    return %c0_i32, %c0_i32_0 : i32, i32
  }
  func.func @transform_2(%arg0: i32) -> (i32, i32) {
    %c0_i32 = arith.constant 0 : i32
    %c0_i32_0 = arith.constant 0 : i32
    %c0_i32_1 = arith.constant 0 : i32
    return %c0_i32, %c0_i32_0 : i32, i32
  }
  func.func @transform_3(%arg0: i32) -> (i32, i32) {
    %c0_i32 = arith.constant 0 : i32
    %c0_i32_0 = arith.constant 0 : i32
    %c0_i32_1 = arith.constant 0 : i32
    return %c0_i32, %c0_i32_0 : i32, i32
  }
  func.func @transform_4(%arg0: i32) -> (i32, i32, i32) {
    %c0_i32 = arith.constant 0 : i32
    %c0_i32_0 = arith.constant 0 : i32
    %c0_i32_1 = arith.constant 0 : i32
    return %arg0, %c0_i32, %c0_i32_0 : i32, i32, i32
  }
}

</mosaic_0001>

<bundles_post_ra>
// kernel: tpu_custom_call.1
= control target key start
LH: loop header
LB: loop body
LE: loop exit
PB: predicated region body
PF: predicated region fallthrough
CT: control target
= control target key end

     0   :  { %9 = vsyncpa [#allocation5], 0  ;;  %s1015_s0 = inlined_call_operand.hbm [shape: f32[2,4,256], index: 0, kind: input, shape index: {}]   ;;  %s1016_s1 = inlined_call_operand.vmem [shape: f32[8,72], index: 1, kind: input, shape index: {}]   ;;  %s1017_s2 = inlined_call_operand.vmem [shape: f32[8,1], index: 2, kind: input, shape index: {}]   ;;  %s1018_s3 = inlined_call_operand.vmem [shape: f32[2,256], index: 3, kind: input, shape index: {}]   ;;  %s1019_s4 = inlined_call_operand.hbm [shape: f32[2,8,256], index: 4, kind: output, shape index: {}]  }
   0x1   :  { %11 = vsyncpa [#allocation5 + $0x1], 0 }
   0x2   :  { %12 = vsyncpa [#allocation6], 0 }
   0x3   :  { %14 = vsyncpa [#allocation6 + $0x1], 0  ;;  %s827_s15 = smov 0   ;;  %s829_s16 = smov 0  }
   0x4   :  { %s831_s17 = smov 0   ;;  %s833_s18 = smov 0  }
   0x5 LB: > { %s848_s19 = sadd.s32 4294967295, %s788_s18   ;;  %s608_s20 = sadd.s32 4294967294, %s788_s18   ;;  %s788_s18 = sphi %s833_s18, %s1036_s18   ;;  %s784_s17 = sphi %s831_s17, %s1035_s17   ;;  %s780_s16 = sphi %s829_s16, %s1034_s16   ;;  %s776_s15 = sphi %s827_s15, %s1033_s15  }
   0x6   : > { %s852_s21 = sadd.s32 1, %s788_s18   ;;  %s27_s22 = sadd.s32 1, %s784_s17 }
   0x7   : > { %s24_s23 = ssub.s32 %s788_s18, %s852_s21  ;;  %p34_p0 = scmp.ne.s32.totalorder %s784_s17, %s780_s16 }
   0x8   : > { %p25_p1 = scmp.eq.s32.totalorder %s24_s23, 0  ;;  %p35_p2 = scmp.eq.s32.totalorder %s788_s18, 0 }
   0x9   : > { %p40_p3 = scmp.ne.s32.totalorder %s780_s16, %s776_s15  ;;  %p41_p4 = scmp.eq.s32.totalorder %s848_s19, 0 }
   0xa   : > { %s864_s24 = scalar_select %p25_p1, %s784_s17, %s27_s22  }
   0xb   : > { %p866_p5 = por %p35_p2, %p34_p0  ;;  %p870_p6 = por %p41_p4, %p40_p3 }
   0xc   : > { %p127_p7 = scmp.eq.s32.totalorder %s848_s19, 1  ;;  %p133_p8 = scmp.eq.s32.totalorder %s608_s20, 1 }
   0xd   : > { %s1023_s26 = scalar_select %p870_p6, 1, 0 }
   0xe   : > { %p650_p10 = scmp.lt.s32.totalorder %s788_s18, 2  ;;  %p877_p11 = por %p127_p7, %p34_p0 }
   0xf   : > { %p881_p12 = por %p133_p8, %p40_p3  ;;  %s162_s29 = sand.u32 1, %s784_s17  }
  0x10   : > { %s1024_s27 = scalar_select %p877_p11, 1, 0 }
  0x11   : > { %s1025_s28 = scalar_select %p881_p12, 1, 0 }
  0x12   : > { %s624_s30 = sshll.u32 %s788_s18, 7  ;;  %s611_s5 = sshll.u32 %s162_s29, 3 }
  0x13   : > { %s890_s8 = scalar_lea.hbm %s1015_s0, %s624_s30  ;;  %s166_s9 = scalar_lea.vmem [#allocation4], %s611_s5 }
  0x14   : > { %s174_s10 = sshll.u32 %s166_s9, 4  ;;  %p894_p13 = pnand %p650_p10, %p866_p5  ;;  %s898_s10 = int_to_ptr.vmem [resolvable:$true] %s174_s10 }
  0x15   : > { %s163_s12 = scalar_lea.sflag [#allocation5], %s162_s29  ;;  %s696_s13 = scalar_lea.hbm %s890_s8, 128 }
  0x16   : > { %p697_p2 = scmp.ne.s32.totalorder %s890_s8, %s696_s13  ;;  %p698_p3 = pneg %p894_p13 }
  0x17   : > { %s701_s22 = scalar_lea.hbm %s1015_s0, 256  ;;  %p702_p5 = scmp.lt.s32.totalorder %s890_s8, %s1015_s0 }
  0x18   : > { %p699_p4 = pnand %p698_p3, %p697_p2  ;;  %p703_p8 = scmp.lt.s32.totalorder %s701_s22, %s696_s13 }
  0x1a   : > { %p700_p7 = pneg %p699_p4  ;;  %p704_p10 = por %p703_p8, %p702_p5 }
  0x1c   : > { %p705_p9 = pnand %p704_p10, %p700_p7 }
  0x1e   : > { %708 = shalt.err (!%p705_p9)
}
  0x1f   : > { %s709_s29 = scalar_lea.vmem %s898_s10, 128  ;;  %s790_s30 = smov [#allocation4]  }
  0x20   : > { %p710_p0 = scmp.ne.s32.totalorder %s898_s10, %s709_s29  ;;  %s714_s5 = sshll.u32 %s790_s30, 4  ;;  %s715_s5 = int_to_ptr.vmem [resolvable:$false] %s714_s5 }
  0x21   : > { %s716_s6 = scalar_lea.vmem %s715_s5, 256  ;;  %p717_p4 = scmp.lt.s32.totalorder %s898_s10, %s715_s5 }
  0x22   : > { %p712_p1 = pnand %p710_p0, %p698_p3  ;;  %p718_p12 = scmp.lt.s32.totalorder %s716_s6, %s709_s29 }
  0x24   : > { %p713_p2 = pneg %p712_p1  ;;  %p719_p11 = por %p718_p12, %p717_p4 }
  0x26   : > { %p720_p6 = pnand %p719_p11, %p713_p2 }
  0x28   : > { %723 = shalt.err (!%p720_p6)
}
  0x29   : > { %645 = dma.hbm_to_vmem [thread:$0]  (!%p894_p13), %s890_s8, 128, %s898_s10, %s163_s12  }
  0x2a   : > { %p1027_p9 = scmp.lt.s32.totalorder %s788_s18, 3  ;;  %p1028_p7 = scmp.ge.s32.totalorder %s788_s18, 1 }
  0x2c   : > { %p180_p0 = pnand %p1028_p7, %p1027_p9 }
  0x2d   : > { %s925_s7 = sand.u32 (!%p180_p0), 1, %s780_s16   ;;  %p1029_p6 = scmp.ne.s32.totalorder (!%p180_p0), %s1023_s26, 0 }
  0x2e   : > { %183 = sbr.rel (%p180_p0) target bundleno = 431 (0x1af), region = 36  ;;  %s615_s9 = sshll.u32 (!%p180_p0), %s925_s7, 3 }
  0x2f   : > { %s186_s13 = scalar_lea.sflag (!%p180_p0), [#allocation5], %s925_s7  ;;  %s189_s14 = scalar_lea.vmem (!%p180_p0), [#allocation4], %s615_s9 }
  0x33   : > { %767 = dma.done.wait (%p1029_p6), %s186_s13, 128  }
  0x34   : > { %769 = vsyncadd (%p1029_p6), %s186_s13, 4294967168  ;;  %v791_v0 = vmov 0.0   ;;  %s792_s8 = smov 111   ;;  %s793_s10 = smov 113   ;;  %v794_v1 = vmov 0   ;;  %v245_v2 = vld [vmem:[%s189_s14] sm:$0xff]  ;;  %v221_v7 = vlaneseq }
  0x35   : > { %408 = vrot.lane.b32.xlu0 %v791_v0, %s792_s8  ;;  %215 = vst [vmem:[#allocation2] sm:$0xff] %v791_v0  ;;  %216 = vst [vmem:[#allocation2 + $0x18] sm:$0xff] %v791_v0  ;;  %368 = vrot.lane.b32.xlu1 %v791_v0, %s793_s10  ;;  %s795_s11 = smov 112   ;;  %v247_v3 = vcombine.high %v245_v2, %v245_v2  ;;  %s796_s26 = smov 127   ;;  %v438_v6 = vld [vmem:[%s1017_s2] sm:$0xff]  ;;  %vm410_vm2 = vcmask 908288  }
  0x36   : > { %512 = vmatprep.mubr.f32.mxu0 %v791_v0  ;;  %694 = vset.pattern.permute.xlu0 %v794_v1  ;;  %249 = vst [vmem:[#allocation2] sm:$0xf] %v245_v2  ;;  %s797_s12 = smov 1   ;;  %s798_s20 = smov 15   ;;  %v222_v10 = vshrl.u32 %v221_v7, 7  ;;  %vm391_vm5 = vcmask 916480  }
  0x37   : > { %250 = vst [vmem:[#allocation2 + $0x18] sm:$0xf] %v247_v3  ;;  %s799_s22 = smov 16   ;;  %s800_s23 = smov 17   ;;  %vm370_vm6 = vcmask 924672   ;;  %vm349_vm9 = vcmask 1039360  }
  0x38   : > { %v617_v9 = vld [vmem:[%s1018_s3 + $0x1] ss:$2 sm:$0x3]  ;;  %v227_v13 = vsub.s32 1, %v222_v10  ;;  %v223_v15 = vsub.s32 0, %v222_v10  ;;  %vm324_vm10 = vcmask 7168  }
  0x39   : > { %389 = vrot.lane.b32.xlu0 %v791_v0, %s795_s11  ;;  %vm233_vm0 = vcmp.gt.f32.partialorder %v617_v9, 0.0  ;;  %v218_v16 = vld [vmem:[%s1018_s3] ss:$2 sm:$0x3]  ;;  %vm303_vm11 = vcmask 121856   ;;  %vm284_vm12 = vcmask 130048  }
  0x3a   : > { %v234_v14 = vsel %vm233_vm0, 1, %v794_v1  ;;  %vm219_vm1 = vcmp.gt.f32.partialorder %v218_v16, 0.0  ;;  %vm263_vm13 = vcmask 138240   ;;  %v419_v58 = vld [vmem:[%s1016_s1] sm:$0xff]  ;;  %vm444_vm14 = vcmask 588800   ;;  %p1030_p12 = scmp.ne.s32.totalorder %s1024_s27, 0 }
  0x3b   : > { %v242_v17 = vrot.slane %v234_v14, %v227_v13  ;;  %v238_v20 = vrot.slane %v234_v14, %v223_v15  ;;  %v220_v21 = vsel %vm219_vm1, 1, %v794_v1  ;;  %s801_s29 = smov [#allocation7]  }
  0x3c   : > { %v228_v26 = vrot.slane %v220_v21, %v227_v13  ;;  %v224_v27 = vrot.slane %v220_v21, %v223_v15 }
  0x3d   : > { %v933_v4 = vld [vmem:[#allocation2] sm:$0xff]  ;;  %vm244_vm3 = vcmp.eq.s32.totalorder %v242_v17, 1  ;;  %vm243_vm4 = vcmp.eq.s32.totalorder %v238_v20, 1 }
  0x3e   : > { %404 = vrot.lane.b32.xlu1 %v933_v4, %s792_s8  ;;  %364 = vrot.lane.b32.xlu0 %v933_v4, %s793_s10  ;;  %v937_v5 = vld [vmem:[#allocation2 + $0x18] sm:$0xff]  ;;  %vm230_vm7 = vcmp.eq.s32.totalorder %v228_v26, 1  ;;  %vm229_vm8 = vcmp.eq.s32.totalorder %v224_v27, 1 }
  0x42   : > { %385 = vrot.lane.b32.xlu1 %v933_v4, %s795_s11  ;;  %406 = vrot.lane.b32.xlu0 %v937_v5, %s792_s8  ;;  %s616_s8 = sshll.u32 %s925_s7, 4 }
  0x46   : > { %387 = vrot.lane.b32.xlu1 %v937_v5, %s795_s11  ;;  %366 = vrot.lane.b32.xlu0 %v937_v5, %s793_s10  ;;  %s625_s10 = sshll.u32 %s848_s19, 8  ;;  %s213_s11 = scalar_lea.vmem [#allocation7], %s616_s8 }
  0x47   : > { %s728_s19 = sshll.u32 %s801_s29, 4  ;;  %s729_s19 = int_to_ptr.vmem [resolvable:$false] %s728_s19 }
  0x48   : > { %s730_s30 = scalar_lea.vmem %s729_s19, 512 }
  0x4a   : > { %345 = vrot.lane.b32.xlu1 %v937_v5, %s796_s26  ;;  %347 = vrot.lane.b32.xlu0 %v791_v0, %s796_s26 }
  0x4e   : > { %343 = vrot.lane.b32.xlu1 %v933_v4, %s796_s26  ;;  %320 = vrot.lane.b32.xlu0 %v933_v4, %s797_s12  ;;  %s538_s26 = sshll.u32 %s213_s11, 4  ;;  %s539_s26 = int_to_ptr.vmem [resolvable:$true] %s538_s26 }
  0x4f   : > { %s724_s25 = scalar_lea.vmem %s539_s26, 256  ;;  %p731_p3 = scmp.lt.s32.totalorder %s539_s26, %s729_s19 }
  0x50   : > { %p725_p11 = scmp.ne.s32.totalorder %s539_s26, %s724_s25  ;;  %p732_p5 = scmp.lt.s32.totalorder %s730_s30, %s724_s25 }
  0x52   : > { %322 = vrot.lane.b32.xlu1 %v937_v5, %s797_s12  ;;  %318 = vrot.lane.b32.xlu0 %v791_v0, %s797_s12  ;;  %p726_p13 = pnand %p725_p11, %p1030_p12  ;;  %p733_p8 = por %p732_p5, %p731_p3 }
  0x54   : > { %p727_p1 = pneg %p726_p13 }
  0x56   : > { %299 = vrot.lane.b32.xlu1 %v933_v4, %s798_s20  ;;  %301 = vrot.lane.b32.xlu0 %v937_v5, %s798_s20  ;;  %p734_p10 = pnand %p733_p8, %p727_p1 }
  0x5a   : > { %297 = vrot.lane.b32.xlu1 %v791_v0, %s798_s20  ;;  %280 = vrot.lane.b32.xlu0 %v933_v4, %s799_s22 }
  0x5e   : > { %282 = vrot.lane.b32.xlu1 %v937_v5, %s799_s22  ;;  %278 = vrot.lane.b32.xlu0 %v791_v0, %s799_s22  ;;  %s536_s22 = scalar_lea.hbm %s1019_s4, %s625_s10 }
  0x62   : > { %259 = vrot.lane.b32.xlu1 %v933_v4, %s800_s23  ;;  %261 = vrot.lane.b32.xlu0 %v937_v5, %s800_s23 }
  0x66   : > { %257 = vrot.lane.b32.xlu1 %v791_v0, %s800_s23  ;;  %441 = vperm.xlu0 %694, %v438_v6   ;;  %s524_s23 = scalar_lea.sflag [#allocation6], %s925_s7 }
  0xa7   : > { %v409_v8 = vpop.permute.xlu0 %408  ;;  %v369_v11 = vpop.permute.xlu1 %368 }
  0xab   : > { %v390_v12 = vpop.permute.xlu0 %389 }
  0xb0   : > { %v405_v18 = vpop.permute.xlu1 %404  ;;  %v365_v19 = vpop.permute.xlu0 %364 }
  0xb4   : > { %v386_v22 = vpop.permute.xlu1 %385  ;;  %v407_v23 = vpop.permute.xlu0 %406 }
  0xb5   : > { %v412_v24 = vsel %vm410_vm2, %v407_v23, %v409_v8  ;;  %v411_v25 = vsel %vm410_vm2, %v405_v18, %v407_v23 }
  0xb6   : > { %626 = vmatprep.subr.msk.mxu0 %vm244_vm3, %v412_v24 }
  0xb7   : > { %627 = vmatpush1.msk.msra.mxu0 %vm243_vm4, %v411_v25 }
  0xb8   : > { %v388_v28 = vpop.permute.xlu1 %387  ;;  %v367_v29 = vpop.permute.xlu0 %366 }
  0xb9   : > { %v393_v30 = vsel %vm391_vm5, %v388_v28, %v390_v12  ;;  %v392_v31 = vsel %vm391_vm5, %v386_v22, %v388_v28  ;;  %v372_v32 = vsel %vm370_vm6, %v367_v29, %v369_v11  ;;  %v371_v33 = vsel %vm370_vm6, %v365_v19, %v367_v29 }
  0xba   : > { %464 = vmatprep.subr.mxu0 %v393_v30 }
  0xbb   : > { %465 = vmatpush1.msra.mxu0 %v392_v31 }
  0xbc   : > { %v346_v34 = vpop.permute.xlu1 %345  ;;  %628 = vmatprep.subr.msk.mxu0 %vm230_vm7, %v372_v32  ;;  %v348_v35 = vpop.permute.xlu0 %347 }
  0xbd   : > { %629 = vmatpush1.msk.msra.mxu0 %vm229_vm8, %v371_v33  ;;  %v351_v36 = vsel %vm349_vm9, %v346_v34, %v348_v35 }
  0xbe   : > { %630 = vmatprep.subr.msk.mxu0 %vm244_vm3, %v351_v36 }
  0xc0   : > { %v344_v37 = vpop.permute.xlu1 %343  ;;  %v321_v38 = vpop.permute.xlu0 %320 }
  0xc1   : > { %v350_v39 = vsel %vm349_vm9, %v344_v37, %v346_v34 }
  0xc2   : > { %631 = vmatpush1.msk.msra.mxu0 %vm243_vm4, %v350_v39 }
  0xc3   : > { %470 = vmatprep.subr.mxu0 %v937_v5 }
  0xc4   : > { %v323_v40 = vpop.permute.xlu1 %322  ;;  %471 = vmatpush1.msra.mxu0 %v933_v4  ;;  %v319_v41 = vpop.permute.xlu0 %318 }
  0xc5   : > { %v326_v42 = vsel %vm324_vm10, %v321_v38, %v323_v40  ;;  %v325_v43 = vsel %vm324_vm10, %v319_v41, %v321_v38 }
  0xc6   : > { %632 = vmatprep.subr.msk.mxu0 %vm230_vm7, %v326_v42 }
  0xc7   : > { %633 = vmatpush1.msk.msra.mxu0 %vm229_vm8, %v325_v43 }
  0xc8   : > { %v300_v44 = vpop.permute.xlu1 %299  ;;  %v302_v45 = vpop.permute.xlu0 %301 }
  0xc9   : > { %v305_v46 = vsel %vm303_vm11, %v300_v44, %v302_v45 }
  0xca   : > { %634 = vmatprep.subr.msk.mxu0 %vm244_vm3, %v305_v46 }
  0xcc   : > { %v298_v47 = vpop.permute.xlu1 %297  ;;  %v281_v48 = vpop.permute.xlu0 %280 }
  0xcd   : > { %v304_v49 = vsel %vm303_vm11, %v298_v47, %v300_v44 }
  0xce   : > { %635 = vmatpush1.msk.msra.mxu0 %vm243_vm4, %v304_v49 }
  0xd0   : > { %v283_v50 = vpop.permute.xlu1 %282  ;;  %v279_v51 = vpop.permute.xlu0 %278 }
  0xd1   : > { %v286_v52 = vsel %vm284_vm12, %v281_v48, %v283_v50  ;;  %v285_v53 = vsel %vm284_vm12, %v279_v51, %v281_v48 }
  0xd2   : > { %476 = vmatprep.subr.mxu0 %v286_v52 }
  0xd3   : > { %477 = vmatpush1.msra.mxu0 %v285_v53 }
  0xd4   : > { %v260_v54 = vpop.permute.xlu1 %259  ;;  %v262_v55 = vpop.permute.xlu0 %261 }
  0xd5   : > { %v265_v56 = vsel %vm263_vm13, %v260_v54, %v262_v55 }
  0xd6   : > { %636 = vmatprep.subr.msk.mxu0 %vm230_vm7, %v265_v56 }
  0xd8   : > { %v258_v57 = vpop.permute.xlu1 %257 }
  0xd9   : > { %v264_v59 = vsel %vm263_vm13, %v258_v57, %v260_v54 }
  0xda   : > { %637 = vmatpush1.msk.msra.mxu0 %vm229_vm8, %v264_v59 }
  0xdb   : > { %618 = vmatmul.mubr.msk.f32.vlgmr.msra.gmra.mxu0 %vm444_vm14, %v419_v58 }
  0xe1   : > { %v442_v60 = vpop.permute.xlu0 %441 }
 0x19b   : > { %v514_v61 = vpop.f32.mrf.mxu0 }
 0x19c   : > { %v515_v62 = vadd.f32 %v514_v61, %v442_v60 }
 0x19d   : > { %v516_v63 = vpop.f32.mrf.mxu0 }
 0x19e   : > { %v519_v0 = vmax.f32 %v515_v62, 0.0  ;;  %v517_v1 = vadd.f32 %v516_v63, %v442_v60 }
 0x1a0   : > { %521 = vst [vmem:[%s213_s11] sm:$0xff] %v519_v0  ;;  %v520_v2 = vmax.f32 %v517_v1, 0.0 }
 0x1a2   : > { %522 = vst [vmem:[%s213_s11 + $0x8] sm:$0xff] %v520_v2 }
 0x1a3   : > { %737 = shalt.err (!%p734_p10)
}
 0x1a4   : > { %s738_s5 = scalar_lea.hbm %s536_s22, 256  ;;  %s742_s9 = scalar_lea.hbm %s1019_s4, 512 }
 0x1a5   : > { %p739_p2 = scmp.ne.s32.totalorder %s536_s22, %s738_s5  ;;  %p743_p7 = scmp.lt.s32.totalorder %s536_s22, %s1019_s4 }
 0x1a6   : > { %p744_p0 = scmp.lt.s32.totalorder %s742_s9, %s738_s5 }
 0x1a7   : > { %p740_p4 = pnand %p739_p2, %p1030_p12 }
 0x1a8   : > { %p745_p6 = por %p744_p0, %p743_p7 }
 0x1a9   : > { %p741_p9 = pneg %p740_p4 }
 0x1ab   : > { %p746_p11 = pnand %p745_p6, %p741_p9 }
 0x1ad   : > { %749 = shalt.err (!%p746_p11)
}
 0x1ae   : > { %640 = dma.vmem_to_hbm [thread:$0]  (%p1030_p12), %s539_s26, 256, %s536_s22, %s524_s23  }
 0x1af PF: > { %s550_s8 = sand.u32 1, %s776_s15   ;;  %p1031_p13 = scmp.ne.s32.totalorder %s1025_s28, 0 }
 0x1b0   : > { %p1032_p1 = scmp.ge.s32.totalorder %s788_s18, 2  ;;  %s551_s10 = scalar_lea.sflag [#allocation6], %s550_s8 }
 0x1b2   : > { %p647_p3 = pnand %p1032_p1, %p1031_p13 }
 0x1b4   : > { %p648_p5 = pneg %p647_p3 }
 0x1b6   : > { %771 = dma.done.wait (%p648_p5), %s551_s10, 256  }
 0x1b7   : > { %773 = vsyncadd (%p648_p5), %s551_s10, 4294967040  ;;  %p17_p8 = scmp.ge.s32.totalorder %s852_s21, 4   ;;  %s1033_s15 = smov %s780_s16 }
 0x1b8   : > { %s1034_s16 = smov %s784_s17  ;;  %s1035_s17 = smov %s864_s24 }
 0x1b9   : > { %s1036_s18 = smov %s852_s21  ;;  %19 = sbr.rel (!%p17_p8) target bundleno = 5 (0x5), region = 82 }
 0x1be   :  { %556 = vsyncpa [#allocation5], 1 }
 0x1bf   :  { %558 = vsyncpa [#allocation5 + $0x1], 1 }
 0x1c0   :  { %559 = vsyncpa [#allocation6], 1 }
 0x1c1   :  { %561 = vsyncpa [#allocation6 + $0x1], 1 }

</bundles_post_ra>
